<compile_context>
chip_gen: v6e
topology: v6e:2x2x1
jax: 0.10.0
libtpu: 0.0.40
codegen_flags: <defaults>
</compile_context>

<pallas_src>
import math

import jax
import jax.numpy as jnp
from jax.experimental import pallas as pl
from jax.experimental.pallas import tpu as pltpu


def attention_kernel(enc_ref, dec_ref, we_ref, wd_ref, bc_ref, wf_ref,
                     awe_ref, alpha_ref):
    Bt, P, E = enc_ref.shape
    A = we_ref.shape[1]

    enc3 = enc_ref[...]                                  # (Bt, P, E)
    enc2 = enc3.reshape(Bt * P, E)                       # dense MXU rows

    # encoder projection: one (Bt*P, E) @ (E, A) MXU matmul, f32 accumulation
    att1 = jnp.dot(enc2, we_ref[...], preferred_element_type=jnp.float32)
    # decoder projection (+ folded bias be+bd): one (Bt, D) @ (D, A) matmul
    att2 = jnp.dot(dec_ref[...], wd_ref[...],
                   preferred_element_type=jnp.float32) + bc_ref[...]

    # relu(att1 + att2 broadcast over pixels) in f32 -> (Bt, P, A)
    h = jnp.maximum(att1.reshape(Bt, P, A) + att2[:, None, :], 0.0)

    # scores: VPU multiply by wf row + lane reduce -> lane-dense (Bt, P).
    # full_att bias omitted: softmax is shift-invariant along the pixel axis.
    e = jnp.sum(h * wf_ref[...][None, :, :], axis=-1)

    # softmax over the pixel axis (lane axis), in f32
    m = jnp.max(e, axis=-1, keepdims=True)
    ex = jnp.exp(e - m)
    alpha = ex / jnp.sum(ex, axis=-1, keepdims=True)     # (Bt, P), f32

    # attention-weighted encoding: VPU weighted sum, f32 accumulation.
    # (replaces the old block-diagonal MXU matmul whose zero-fraction grew
    #  quadratically in Bt)
    awe = jnp.sum(enc3.astype(jnp.float32) * alpha[:, :, None], axis=1)  # (Bt, E)

    awe_ref[...] = awe.astype(awe_ref.dtype)
    alpha_ref[...] = alpha.astype(alpha_ref.dtype)       # lane-dense store


def _choose_block_b(B, block_b):
    """Pick the batch block: big for MXU occupancy, but keep >=2 grid steps
    when B > 8 so both v7x TensorCores get work; multiple of 8 sublanes."""
    Bt = min(block_b, B)
    if B > 8:
        Bt = min(Bt, (B + 1) // 2)       # at least 2 grid steps
    if Bt >= 8:
        Bt = (Bt // 8) * 8               # multiple of 8 sublanes
    return max(Bt, 1)


def attention_pallas(encoder_out, decoder_hidden, params, *, block_b=64,
                     compute_dtype=jnp.float32):
    """Soft-attention forward.

    block_b: max batch elements per grid step (the wrapper may lower it to
        keep >=2 grid steps on v7x; it is kept a multiple of 8).
    compute_dtype: dtype for the big MXU operands (encoder_out, W_enc, W_dec).
        Use jnp.bfloat16 in production on ALL TPU generations (v5e/v6e/v7x
        MXUs are bf16-native); accumulation, softmax and the attention-
        weighted sum stay in f32 regardless.
    """
    we, be, wd, bd, wf, bf = params                      # bf unused (no-op for alpha/awe)
    del bf
    B, P, E = encoder_out.shape
    D = decoder_hidden.shape[1]
    A = we.shape[1]
    out_dtype = encoder_out.dtype

    Bt = _choose_block_b(B, block_b)
    Bp = pl.cdiv(B, Bt) * Bt
    if Bp != B:
        pad = Bp - B
        encoder_out = jnp.pad(encoder_out, ((0, pad), (0, 0), (0, 0)))
        decoder_hidden = jnp.pad(decoder_hidden, ((0, pad), (0, 0)))

    # Big MXU operands in compute_dtype; bias / wf / softmax path stay f32.
    enc = encoder_out.astype(compute_dtype)
    dec = decoder_hidden.astype(compute_dtype)
    we_c = we.astype(compute_dtype)
    wd_c = wd.astype(compute_dtype)
    bc = (be.astype(jnp.float32) + bd.astype(jnp.float32)).reshape(1, A)
    wf_row = wf.reshape(1, A).astype(jnp.float32)        # row vector for VPU

    out_shape = (jax.ShapeDtypeStruct((Bp, E), out_dtype),
                 jax.ShapeDtypeStruct((Bp, P), out_dtype))

    grid = (Bp // Bt,)
    in_specs = [
        pl.BlockSpec((Bt, P, E), lambda b: (b, 0, 0)),   # encoder_out block
        pl.BlockSpec((Bt, D),    lambda b: (b, 0)),      # decoder_hidden block
        pl.BlockSpec((E, A),     lambda b: (0, 0)),      # W_enc (in, out)
        pl.BlockSpec((D, A),     lambda b: (0, 0)),      # W_dec (in, out)
        pl.BlockSpec((1, A),     lambda b: (0, 0)),      # combined bias be+bd
        pl.BlockSpec((1, A),     lambda b: (0, 0)),      # w_full as a row
    ]
    out_specs = (
        pl.BlockSpec((Bt, E), lambda b: (b, 0)),   # attention_weighted_encoding
        pl.BlockSpec((Bt, P), lambda b: (b, 0)),   # alpha (lane-dense rows)
    )
    # TODO(synk): for the real model (P=196) pad P up to a multiple of 128 and
    # mask padded lanes with -inf before the softmax for unmasked alpha stores.

    itemsize = jnp.dtype(compute_dtype).itemsize
    out_itemsize = jnp.dtype(out_dtype).itemsize
    cost = pl.CostEstimate(
        flops=(2 * Bp * P * E * A          # encoder projection
               + 2 * Bp * D * A            # decoder projection
               + 2 * Bp * P * A            # score multiply + lane reduce
               + 2 * Bp * P * E),          # attention-weighted sum
        transcendentals=Bp * P,            # exp in softmax
        bytes_accessed=(Bp * P * E * itemsize + Bp * D * itemsize
                        + (E * A + D * A) * itemsize + 2 * A * 4
                        + Bp * E * out_itemsize + Bp * P * out_itemsize),
    )

    awe, alpha = pl.pallas_call(
        attention_kernel,
        out_shape=out_shape,
        grid=grid,
        in_specs=in_specs,
        out_specs=out_specs,
        compiler_params=pltpu.CompilerParams(
            dimension_semantics=("parallel",),
            # explicit, generation-safe VMEM budget (v7x has only 64 MiB phys)
            vmem_limit_bytes=32 * 1024 * 1024,
        ),
        cost_estimate=cost,
    )(enc, dec, we_c, wd_c, bc, wf_row)

    if Bp != B:
        awe, alpha = awe[:B], alpha[:B]
    return awe, alpha


def attention_ref(encoder_out, decoder_hidden, params):
    """Plain-JAX reference mirroring the PyTorch forward exactly."""
    we, be, wd, bd, wf, bf = params
    att1 = encoder_out @ we + be                       # (B, P, A)
    att2 = decoder_hidden @ wd + bd                    # (B, A)
    h = jnp.maximum(att1 + att2[:, None, :], 0.0)      # (B, P, A)
    att = (h @ wf)[..., 0] + bf[0, 0]                  # (B, P)
    alpha = jax.nn.softmax(att, axis=1)                # (B, P)
    awe = jnp.sum(encoder_out * alpha[..., None], axis=1)   # (B, E)
    return awe, alpha


def init_linear(key, in_dim, out_dim):
    """Deterministic nn.Linear-style init; weight pre-transposed (in, out)."""
    k = 1.0 / math.sqrt(in_dim)
    kw, kb = jax.random.split(key)
    w = jax.random.uniform(kw, (in_dim, out_dim), jnp.float32, -k, k)
    b = jax.random.uniform(kb, (1, out_dim), jnp.float32, -k, k)
    return w, b


if __name__ == "__main__":
    # Small but vreg-friendly shapes: batch=16 (the wrapper picks Bt=8 -> 2
    # grid steps, both v7x TCs busy), num_pixels=16 (4x4 feature map),
    # encoder/decoder/attention dims = 128 (lane-dense).
    B, P, E, D, A = 16, 16, 128, 128, 128

    key = jax.random.PRNGKey(0)
    k_enc, k_dec, k_full, k_x, k_h = jax.random.split(key, 5)

    we, be = init_linear(k_enc, E, A)       # encoder_att
    wd, bd = init_linear(k_dec, D, A)       # decoder_att
    wf, bf = init_linear(k_full, A, 1)      # full_att
    params = (we, be, wd, bd, wf, bf)

    encoder_out = jax.random.normal(k_x, (B, P, E), jnp.float32)
    decoder_hidden = jax.random.normal(k_h, (B, D), jnp.float32)

    # f32 here so the check against the f32 reference is tight;
    # pass compute_dtype=jnp.bfloat16 in production (all TPU generations).
    awe, alpha = attention_pallas(encoder_out, decoder_hidden, params)
    jax.block_until_ready((awe, alpha))

    awe_r, alpha_r = attention_ref(encoder_out, decoder_hidden, params)
    assert awe.shape == (B, E) and alpha.shape == (B, P)
    assert jnp.allclose(awe, awe_r, atol=1e-4, rtol=1e-4)
    assert jnp.allclose(alpha, alpha_r, atol=1e-4, rtol=1e-4)

    print("KERNEL_OK")
</pallas_src>

<mosaic_0001>
module attributes {stable_mosaic.version = 11 : i64} {
  func.func @attention_kernel(%arg0: i32, %arg1: memref<8x16x128xf32, #tpu.memory_space<vmem>>, %arg2: memref<8x128xf32, #tpu.memory_space<vmem>>, %arg3: memref<128x128xf32, #tpu.memory_space<vmem>>, %arg4: memref<128x128xf32, #tpu.memory_space<vmem>>, %arg5: memref<1x128xf32, #tpu.memory_space<vmem>>, %arg6: memref<1x128xf32, #tpu.memory_space<vmem>>, %arg7: memref<8x128xf32, #tpu.memory_space<vmem>>, %arg8: memref<8x16xf32, #tpu.memory_space<vmem>>) attributes {dimension_semantics = [#tpu.dimension_semantics<parallel>], iteration_bounds = array<i64: 2>, scalar_prefetch = 0 : i64, scratch_operands = 0 : i64, tpu.core_type = #tpu.core_type<tc>, window_params = [{transform_indices = @transform_0, window_bounds = array<i64: 8, 16, 128>}, {transform_indices = @transform_1, window_bounds = array<i64: 8, 128>}, {pipeline_mode = #tpu.pipeline_mode<synchronous>, transform_indices = @transform_2, window_bounds = array<i64: 128, 128>}, {pipeline_mode = #tpu.pipeline_mode<synchronous>, transform_indices = @transform_3, window_bounds = array<i64: 128, 128>}, {pipeline_mode = #tpu.pipeline_mode<synchronous>, transform_indices = @transform_4, window_bounds = array<i64: 1, 128>}, {pipeline_mode = #tpu.pipeline_mode<synchronous>, transform_indices = @transform_5, window_bounds = array<i64: 1, 128>}, {transform_indices = @transform_6, window_bounds = array<i64: 8, 128>}, {transform_indices = @transform_7, window_bounds = array<i64: 8, 16>}]} {
    %c0 = arith.constant 0 : index
    %c0_0 = arith.constant 0 : index
    %c0_1 = arith.constant 0 : index
    %0 = vector.load %arg1[%c0, %c0_0, %c0_1] : memref<8x16x128xf32, #tpu.memory_space<vmem>>, vector<8x16x128xf32>
    %1 = vector.shape_cast %0 : vector<8x16x128xf32> to vector<128x128xf32>
    %c0_2 = arith.constant 0 : index
    %c0_3 = arith.constant 0 : index
    %2 = vector.load %arg3[%c0_2, %c0_3] : memref<128x128xf32, #tpu.memory_space<vmem>>, vector<128x128xf32>
    %cst = arith.constant dense<0.000000e+00> : vector<128x128xf32>
    %3 = tpu.matmul %1, %2, %cst {dimension_numbers = #tpu.dot_dimension_numbers<[1], [0], [0], [1], [0, 0, 1, 1], [], []>} : vector<128x128xf32>, vector<128x128xf32>, vector<128x128xf32> -> vector<128x128xf32>
    %c0_4 = arith.constant 0 : index
    %c0_5 = arith.constant 0 : index
    %4 = vector.load %arg2[%c0_4, %c0_5] : memref<8x128xf32, #tpu.memory_space<vmem>>, vector<8x128xf32>
    %c0_6 = arith.constant 0 : index
    %c0_7 = arith.constant 0 : index
    %5 = vector.load %arg4[%c0_6, %c0_7] : memref<128x128xf32, #tpu.memory_space<vmem>>, vector<128x128xf32>
    %cst_8 = arith.constant dense<0.000000e+00> : vector<8x128xf32>
    %6 = tpu.matmul %4, %5, %cst_8 {dimension_numbers = #tpu.dot_dimension_numbers<[1], [0], [0], [1], [0, 0, 1, 1], [], []>} : vector<8x128xf32>, vector<128x128xf32>, vector<8x128xf32> -> vector<8x128xf32>
    %c0_9 = arith.constant 0 : index
    %c0_10 = arith.constant 0 : index
    %7 = vector.load %arg5[%c0_9, %c0_10] : memref<1x128xf32, #tpu.memory_space<vmem>>, vector<1x128xf32>
    %8 = vector.broadcast %7 : vector<1x128xf32> to vector<8x128xf32>
    %9 = arith.addf %6, %8 : vector<8x128xf32>
    %10 = vector.shape_cast %3 : vector<128x128xf32> to vector<8x16x128xf32>
    %11 = vector.shape_cast %9 : vector<8x128xf32> to vector<8x1x128xf32>
    %12 = vector.broadcast %11 : vector<8x1x128xf32> to vector<8x16x128xf32>
    %13 = arith.addf %10, %12 : vector<8x16x128xf32>
    %cst_11 = arith.constant 0.000000e+00 : f32
    %14 = vector.broadcast %cst_11 : f32 to vector<8x16x128xf32>
    %15 = arith.maximumf %13, %14 : vector<8x16x128xf32>
    %c0_12 = arith.constant 0 : index
    %c0_13 = arith.constant 0 : index
    %16 = vector.load %arg6[%c0_12, %c0_13] : memref<1x128xf32, #tpu.memory_space<vmem>>, vector<1x128xf32>
    %17 = vector.shape_cast %16 : vector<1x128xf32> to vector<1x1x128xf32>
    %18 = vector.broadcast %17 : vector<1x1x128xf32> to vector<8x16x128xf32>
    %19 = arith.mulf %15, %18 : vector<8x16x128xf32>
    %cst_14 = arith.constant dense<0.000000e+00> : vector<8x16xf32>
    %20 = vector.multi_reduction <add>, %19, %cst_14 [2] : vector<8x16x128xf32> to vector<8x16xf32>
    %cst_15 = arith.constant dense<0xFF800000> : vector<8xf32>
    %21 = vector.multi_reduction <maximumf>, %20, %cst_15 [1] : vector<8x16xf32> to vector<8xf32>
    %22 = vector.shape_cast %21 : vector<8xf32> to vector<8x1xf32>
    %23 = vector.broadcast %22 : vector<8x1xf32> to vector<8x16xf32>
    %24 = arith.subf %20, %23 : vector<8x16xf32>
    %25 = math.exp %24 : vector<8x16xf32>
    %cst_16 = arith.constant dense<0.000000e+00> : vector<8xf32>
    %26 = vector.multi_reduction <add>, %25, %cst_16 [1] : vector<8x16xf32> to vector<8xf32>
    %27 = vector.shape_cast %26 : vector<8xf32> to vector<8x1xf32>
    %28 = vector.broadcast %27 : vector<8x1xf32> to vector<8x16xf32>
    %29 = arith.divf %25, %28 : vector<8x16xf32>
    %30 = vector.shape_cast %29 : vector<8x16xf32> to vector<8x16x1xf32>
    %31 = vector.broadcast %30 : vector<8x16x1xf32> to vector<8x16x128xf32>
    %32 = arith.mulf %0, %31 : vector<8x16x128xf32>
    %cst_17 = arith.constant dense<0.000000e+00> : vector<8x128xf32>
    %33 = vector.multi_reduction <add>, %32, %cst_17 [1] : vector<8x16x128xf32> to vector<8x128xf32>
    %c0_18 = arith.constant 0 : index
    %c0_19 = arith.constant 0 : index
    %34 = vector.load %arg7[%c0_18, %c0_19] : memref<8x128xf32, #tpu.memory_space<vmem>>, vector<8x128xf32>
    tpu.vector_store %arg7[%c0_18, %c0_19], %33 {strides = array<i32>} : memref<8x128xf32, #tpu.memory_space<vmem>>, vector<8x128xf32>,
    %c0_20 = arith.constant 0 : index
    %c0_21 = arith.constant 0 : index
    %35 = vector.load %arg8[%c0_20, %c0_21] : memref<8x16xf32, #tpu.memory_space<vmem>>, vector<8x16xf32>
    tpu.vector_store %arg8[%c0_20, %c0_21], %29 {strides = array<i32>} : memref<8x16xf32, #tpu.memory_space<vmem>>, vector<8x16xf32>,
    return
  }
  func.func @transform_0(%arg0: i32) -> (i32, i32, i32) {
    %c0_i32 = arith.constant 0 : i32
    %c0_i32_0 = arith.constant 0 : i32
    %c0_i32_1 = arith.constant 0 : i32
    return %arg0, %c0_i32, %c0_i32_0 : i32, i32, i32
  }
  func.func @transform_1(%arg0: i32) -> (i32, i32) {
    %c0_i32 = arith.constant 0 : i32
    %c0_i32_0 = arith.constant 0 : i32
    return %arg0, %c0_i32 : i32, i32
  }
  func.func @transform_2(%arg0: i32) -> (i32, i32) {
    %c0_i32 = arith.constant 0 : i32
    %c0_i32_0 = arith.constant 0 : i32
    %c0_i32_1 = arith.constant 0 : i32
    return %c0_i32, %c0_i32_0 : i32, i32
  }
  func.func @transform_3(%arg0: i32) -> (i32, i32) {
    %c0_i32 = arith.constant 0 : i32
    %c0_i32_0 = arith.constant 0 : i32
    %c0_i32_1 = arith.constant 0 : i32
    return %c0_i32, %c0_i32_0 : i32, i32
  }
  func.func @transform_4(%arg0: i32) -> (i32, i32) {
    %c0_i32 = arith.constant 0 : i32
    %c0_i32_0 = arith.constant 0 : i32
    %c0_i32_1 = arith.constant 0 : i32
    return %c0_i32, %c0_i32_0 : i32, i32
  }
  func.func @transform_5(%arg0: i32) -> (i32, i32) {
    %c0_i32 = arith.constant 0 : i32
    %c0_i32_0 = arith.constant 0 : i32
    %c0_i32_1 = arith.constant 0 : i32
    return %c0_i32, %c0_i32_0 : i32, i32
  }
  func.func @transform_6(%arg0: i32) -> (i32, i32) {
    %c0_i32 = arith.constant 0 : i32
    %c0_i32_0 = arith.constant 0 : i32
    return %arg0, %c0_i32 : i32, i32
  }
  func.func @transform_7(%arg0: i32) -> (i32, i32) {
    %c0_i32 = arith.constant 0 : i32
    %c0_i32_0 = arith.constant 0 : i32
    return %arg0, %c0_i32 : i32, i32
  }
}

</mosaic_0001>

<bundles_post_ra>
// kernel: tpu_custom_call.1
= control target key start
LH: loop header
LB: loop body
LE: loop exit
PB: predicated region body
PF: predicated region fallthrough
CT: control target
= control target key end

     0   :  { %s2929_s0 = inlined_call_operand.hbm [shape: f32[16,16,128], index: 0, kind: input, shape index: {}]   ;;  %s2930_s1 = inlined_call_operand.hbm [shape: f32[16,128], index: 1, kind: input, shape index: {}]   ;;  %s2931_s2 = inlined_call_operand.hbm [shape: f32[128,128], index: 2, kind: input, shape index: {}]   ;;  %s2932_s3 = inlined_call_operand.hbm [shape: f32[128,128], index: 3, kind: input, shape index: {}]   ;;  %s2933_s4 = inlined_call_operand.vmem [shape: f32[1,128], index: 4, kind: input, shape index: {}]   ;;  %s2934_s5 = inlined_call_operand.vmem [shape: f32[1,128], index: 5, kind: input, shape index: {}]   ;;  %s2935_s6 = inlined_call_operand.hbm [shape: f32[16,128], index: 6, kind: output, shape index: {0}]   ;;  %s2936_s7 = inlined_call_operand.hbm [shape: f32[16,16], index: 7, kind: output, shape index: {1}]  }
   0x1   :  { %2947 = sst [smem:[#allocation21_spill]] %s2929_s0 }
   0x2   :  { %2948 = sst [smem:[#allocation22_spill]] %s2931_s2 }
   0x3   :  { %2949 = sst [smem:[#allocation23_spill]] %s2932_s3 }
   0x4   :  { %13 = vsyncpa [#allocation3], 0 }
   0x5   :  { %15 = vsyncpa [#allocation3 + $0x1], 0 }
   0x6   :  { %16 = vsyncpa [#allocation6], 0 }
   0x7   :  { %18 = vsyncpa [#allocation6 + $0x1], 0 }
   0x8   :  { %19 = vsyncpa [#allocation9], 0 }
   0x9   :  { %20 = vsyncpa [#allocation4], 0 }
   0xa   :  { %22 = vsyncpa [#allocation4 + $0x1], 0 }
   0xb   :  { %23 = vsyncpa [#allocation12], 0 }
   0xc   :  { %25 = vsyncpa [#allocation12 + $0x1], 0  ;;  %s2231_s24 = smov 0   ;;  %s2233_s25 = smov 0  }
   0xd   :  { %s2235_s26 = smov 0   ;;  %s2237_s27 = smov 0  }
   0xe LB: > { %2950 = sst [smem:[#allocation19_spill]] %s2173_s26  ;;  %s2252_s28 = sadd.s32 4294967295, %s2177_s27   ;;  %s2177_s27 = sphi %s2237_s27, %s2981_s27   ;;  %s2173_s26 = sphi %s2235_s26, %s2978_s26   ;;  %s2169_s25 = sphi %s2233_s25, %s2980_s25   ;;  %s2165_s24 = sphi %s2231_s24, %s2979_s24  }
   0xf   : > { %s1662_s29 = sadd.s32 4294967294, %s2177_s27   ;;  %p51_p0 = scmp.ne.s32.totalorder %s2169_s25, %s2165_s24 }
  0x10   : > { %p2939_p1 = scmp.eq.s32.totalorder %s2252_s28, 0  ;;  %p185_p2 = scmp.eq.s32.totalorder %s2252_s28, 1 }
  0x11   : > { %p191_p3 = scmp.eq.s32.totalorder %s1662_s29, 1  ;;  %p1663_p5 = scmp.ge.s32.totalorder %s2177_s27, 1 }
  0x12   : > { %p2261_p4 = por %p2939_p1, %p51_p0  ;;  %p224_p7 = scmp.lt.s32.totalorder %s2177_s27, 3 }
  0x13   : > { %p2266_p6 = por %p191_p3, %p51_p0  ;;  %s2179_s10 = smov [#allocation7]  }
  0x14   : > { %s2951_s30 = scalar_select %p2261_p4, 1, 0 }
  0x15   : > { %s2952_s8 = scalar_select %p2266_p6, 1, 0 }
  0x16   : > { %p2271_p8 = pnand %p1663_p5, %p224_p7  ;;  %s236_s11 = sshll.u32 %s2179_s10, 4  ;;  %s237_s11 = int_to_ptr.vmem [resolvable:$true] %s236_s11 }
  0x17   : > { %s2180_s13 = smov [#allocation8]   ;;  %s1974_s15 = scalar_lea.vmem %s237_s11, 2048 }
  0x18   : > { %s2953_s9 = scalar_select %p2271_p8, 1, 0 }
  0x19   : > { %p1846_p9 = pneg %p2271_p8  ;;  %s249_s14 = sshll.u32 %s2180_s13, 4  ;;  %s250_s14 = int_to_ptr.vmem [resolvable:$true] %s249_s14 }
  0x1a   : > { %p1975_p13 = scmp.ne.s32.totalorder %s237_s11, %s1974_s15  ;;  %p1982_p5 = scmp.lt.s32.totalorder %s237_s11, %s237_s11 }
  0x1b   : > { %p2280_p11 = pnand %p1846_p9, %p2939_p1  ;;  %p1983_p7 = scmp.lt.s32.totalorder %s1974_s15, %s1974_s15 }
  0x1d   : > { %p1965_p12 = pneg %p2280_p11  ;;  %p1984_p10 = por %p1983_p7, %p1982_p5 }
  0x1f   : > { %p1977_p0 = pnand %p1975_p13, %p1965_p12 }
  0x21   : > { %p1978_p3 = pneg %p1977_p0 }
  0x23   : > { %p1985_p9 = pnand %p1984_p10, %p1978_p3 }
  0x25   : > { %1988 = shalt.err (!%p1985_p9)
}
  0x26   : > { %s2937_s16 = smov 128   ;;  %s2938_s17 = smov 8  }
  0x27   : > { %s2955_s2 = sld [smem:[#allocation22_spill]]  ;;  %s2000_s20 = scalar_lea.vmem %s250_s14, 2048 }
  0x28   : > { %p2001_p13 = scmp.ne.s32.totalorder %s250_s14, %s2000_s20  ;;  %p2008_p10 = scmp.lt.s32.totalorder %s250_s14, %s250_s14 }
  0x29   : > { %p2009_p3 = scmp.lt.s32.totalorder %s2000_s20, %s2000_s20 }
  0x2a   : > { %p2003_p0 = pnand %p2001_p13, %p1965_p12 }
  0x2b   : > { %p2010_p7 = por %p2009_p3, %p2008_p10 }
  0x2c   : > { %p2004_p5 = pneg %p2003_p0 }
  0x2d   : > { %1849 = dma.hbm_to_vmem [thread:$0]  (!%p2280_p11), %s2955_s2, 2048, %s237_s11, [#allocation6], %s2937_s16, %s2937_s16, %s2938_s17  }
  0x2e   : > { %p2011_p9 = pnand %p2010_p7, %p2004_p5 }
  0x30   : > { %2014 = shalt.err (!%p2011_p9)
}
  0x31   : > { %s2956_s3 = sld [smem:[#allocation23_spill]]  ;;  %s2309_s23 = sadd.s32 1, %s2177_s27  }
  0x32   : > { %s38_s29 = sadd.s32 1, %s2173_s26  ;;  %s35_s10 = ssub.s32 %s2177_s27, %s2309_s23 }
  0x33   : > { %p45_p12 = scmp.ne.s32.totalorder %s2173_s26, %s2169_s25  ;;  %p36_p13 = scmp.eq.s32.totalorder %s35_s10, 0 }
  0x34   : > { %p46_p0 = scmp.eq.s32.totalorder %s2177_s27, 0  ;;  %p1869_p10 = scmp.lt.s32.totalorder %s2177_s27, 2 }
  0x35   : > { %p2319_p5 = por %p185_p2, %p45_p12  ;;  %s2328_s13 = sand.u32 1, %s2173_s26  }
  0x36   : > { %s2325_s12 = scalar_select %p36_p13, %s2173_s26, %s38_s29  }
  0x37   : > { %1852 = dma.hbm_to_vmem [thread:$0]  (!%p2280_p11), %s2956_s3, 2048, %s250_s14, [#allocation9], %s2937_s16, %s2937_s16, %s2938_s17  }
  0x38   : > { %s2957_s11 = scalar_select %p2319_p5, 1, 0 }
  0x39   : > { %2958 = sst [smem:[#allocation20_spill]] %s2325_s12  ;;  %p47_p3 = por %p46_p0, %p45_p12 }
  0x3a   : > { %s1667_s14 = sshll.u32 %s2328_s13, 7  ;;  %s1689_s15 = sshll.u32 %s2177_s27, 11 }
  0x3b   : > { %s2959_s0 = sld [smem:[#allocation21_spill]]  ;;  %s273_s21 = scalar_lea.vmem [#allocation2], %s1667_s14 }
  0x3c   : > { %s281_s22 = sshll.u32 %s273_s21, 4  ;;  %p2339_p2 = pnand %p1869_p10, %p47_p3  ;;  %s2337_s22 = int_to_ptr.vmem [resolvable:$true] %s281_s22 }
  0x3d   : > { %s270_s17 = scalar_lea.sflag [#allocation3], %s2328_s13 }
  0x3e   : > { %p2017_p7 = pneg %p2339_p2 }
  0x41   : > { %s2335_s20 = scalar_lea.hbm %s2959_s0, %s1689_s15  ;;  %s2020_s18 = scalar_lea.hbm %s2959_s0, 4096 }
  0x42   : > { %s2015_s2 = scalar_lea.hbm %s2335_s20, 2048  ;;  %p2021_p13 = scmp.lt.s32.totalorder %s2335_s20, %s2959_s0 }
  0x43   : > { %p2016_p11 = scmp.ne.s32.totalorder %s2335_s20, %s2015_s2  ;;  %p2022_p0 = scmp.lt.s32.totalorder %s2020_s18, %s2015_s2 }
  0x45   : > { %p2018_p9 = pnand %p2017_p7, %p2016_p11  ;;  %p2023_p10 = por %p2022_p0, %p2021_p13 }
  0x47   : > { %p2019_p12 = pneg %p2018_p9 }
  0x49   : > { %p2024_p3 = pnand %p2023_p10, %p2019_p12 }
  0x4b   : > { %2027 = shalt.err (!%p2024_p3)
}
  0x4c   : > { %s2028_s10 = scalar_lea.vmem %s2337_s22, 2048  ;;  %s2183_s14 = smov [#allocation2]  }
  0x4d   : > { %p2029_p1 = scmp.ne.s32.totalorder %s2337_s22, %s2028_s10  ;;  %s2033_s15 = sshll.u32 %s2183_s14, 4  ;;  %s2034_s15 = int_to_ptr.vmem [resolvable:$false] %s2033_s15 }
  0x4e   : > { %s2035_s16 = scalar_lea.vmem %s2034_s15, 4096  ;;  %p2036_p6 = scmp.lt.s32.totalorder %s2337_s22, %s2034_s15 }
  0x4f   : > { %p2031_p11 = pnand %p2029_p1, %p2017_p7  ;;  %p2037_p5 = scmp.lt.s32.totalorder %s2035_s16, %s2028_s10 }
  0x51   : > { %p2032_p9 = pneg %p2031_p11  ;;  %p2038_p4 = por %p2037_p5, %p2036_p6 }
  0x53   : > { %p2039_p13 = pnand %p2038_p4, %p2032_p9 }
  0x55   : > { %2042 = shalt.err (!%p2039_p13)
}
  0x56   : > { %s2961_s2 = smov 8   ;;  %s2962_s18 = smov 128  }
  0x57   : > { %1856 = dma.hbm_to_vmem [thread:$0]  (!%p2339_p2), %s2335_s20, 2048, %s2337_s22, %s270_s17, %s2962_s18, %s2962_s18, %s2961_s2  }
  0x58   : > { %s1672_s19 = sshll.u32 %s2177_s27, 7  ;;  %s2963_s14 = sshll.u32 %s2328_s13, 3 }
  0x59   : > { %s2379_s10 = scalar_lea.hbm %s2930_s1, %s1672_s19  ;;  %s295_s15 = scalar_lea.vmem [#allocation5], %s2963_s14 }
  0x5a   : > { %s302_s0 = sshll.u32 %s295_s15, 4  ;;  %s2964_s3 = sand.u32 1, %s2177_s27   ;;  %s303_s0 = int_to_ptr.vmem [resolvable:$true] %s302_s0 }
  0x5b   : > { %s292_s12 = scalar_lea.sflag [#allocation6], %s2964_s3  ;;  %s2043_s26 = scalar_lea.hbm %s2379_s10, 128 }
  0x5c   : > { %p2044_p1 = scmp.ne.s32.totalorder %s2379_s10, %s2043_s26  ;;  %s2048_s22 = scalar_lea.hbm %s2930_s1, 256 }
  0x5d   : > { %p2049_p5 = scmp.lt.s32.totalorder %s2379_s10, %s2930_s1  ;;  %p2050_p12 = scmp.lt.s32.totalorder %s2048_s22, %s2043_s26 }
  0x5e   : > { %p2046_p4 = pnand %p2044_p1, %p2017_p7 }
  0x5f   : > { %p2051_p0 = por %p2050_p12, %p2049_p5 }
  0x60   : > { %p2047_p6 = pneg %p2046_p4 }
  0x62   : > { %p2052_p10 = pnand %p2051_p0, %p2047_p6 }
  0x64   : > { %2055 = shalt.err (!%p2052_p10)
}
  0x65   : > { %s2056_s18 = scalar_lea.vmem %s303_s0, 128  ;;  %s2184_s3 = smov [#allocation5]  }
  0x66   : > { %p2057_p3 = scmp.ne.s32.totalorder %s303_s0, %s2056_s18  ;;  %s2061_s19 = sshll.u32 %s2184_s3, 4  ;;  %s2062_s19 = int_to_ptr.vmem [resolvable:$false] %s2061_s19 }
  0x67   : > { %s2063_s21 = scalar_lea.vmem %s2062_s19, 256  ;;  %p2064_p13 = scmp.lt.s32.totalorder %s303_s0, %s2062_s19 }
  0x68   : > { %p2059_p11 = pnand %p2057_p3, %p2017_p7  ;;  %p2065_p1 = scmp.lt.s32.totalorder %s2063_s21, %s2056_s18 }
  0x6a   : > { %p2060_p9 = pneg %p2059_p11  ;;  %p2066_p4 = por %p2065_p1, %p2064_p13 }
  0x6c   : > { %p2067_p8 = pnand %p2066_p4, %p2060_p9 }
  0x6e   : > { %2070 = shalt.err (!%p2067_p8)
}
  0x6f   : > { %1859 = dma.hbm_to_vmem [thread:$0]  (!%p2339_p2), %s2379_s10, 128, %s303_s0, %s292_s12  }
  0x70   : > { %p2965_p6 = scmp.ne.s32.totalorder %s2953_s9, 0 }
  0x71   : > { %s2406_s26 = sand.u32 (!%p2965_p6), 1, %s2169_s25   ;;  %p2966_p7 = scmp.ne.s32.totalorder (!%p2965_p6), %s2951_s30, 0 }
  0x72   : > { %311 = sbr.rel (%p2965_p6) target bundleno = 1248 (0x4e0), region = 44  ;;  %s1674_s16 = sshll.u32 (!%p2965_p6), %s2406_s26, 7 }
  0x73   : > { %s314_s14 = scalar_lea.sflag (!%p2965_p6), [#allocation3], %s2406_s26  ;;  %s2410_s15 = scalar_lea.vmem (!%p2965_p6), [#allocation2], %s1674_s16 }
  0x77   : > { %2140 = dma.done.wait (%p2966_p7), %s314_s14, 2048  }
  0x78   : > { %2142 = vsyncadd (%p2966_p7), %s314_s14, 4294965248  ;;  %s322_s0 = sand.u32 1, %s2252_s28   ;;  %s2418_s9 = sshll.u32 %s2406_s26, 3 }
  0x79   : > { %s323_s12 = scalar_lea.sflag [#allocation6], %s322_s0  ;;  %s326_s29 = scalar_lea.vmem [#allocation5], %s2418_s9 }
  0x7a   : > { %2144 = dma.done.wait (%p2966_p7), %s323_s12, 128  }
  0x7b   : > { %2146 = vsyncadd (%p2966_p7), %s323_s12, 4294967168  ;;  %p2967_p8 = scmp.eq.s32.totalorder %s2252_s28, 0 }
  0x7d   : > { %2148 = dma.done.wait (%p2967_p8), [#allocation6], 2048   ;;  %p2968_p2 = pmov %p2967_p8 }
  0x7f   : > { %2150 = vsyncadd (%p2968_p2), [#allocation6], 4294965248  ;;  %p2969_p5 = pmov %p2968_p2 }
  0x80   : > { %p2970_p12 = pmov %p2968_p2 }
  0x81   : > { %2152 = dma.done.wait (%p2969_p5), [#allocation9], 2048  }
  0x82   : > { %2154 = vsyncadd (%p2970_p12), [#allocation9], 4294965248  ;;  %v2185_v0 = vmov 0.0   ;;  %vm2186_vm0 = vmmov 0   ;;  %v407_v1 = vld [vmem:[#allocation7 + $0x78] sm:$0xff]  ;;  %v406_v3 = vld [vmem:[#allocation7 + $0x70] sm:$0xff]  ;;  %v652_v52 = vlaneseq }
  0x83   : > { %1795 = vmatprep.subr.mxu1 %v2185_v0  ;;  %1827 = vmatprep.mubr.msk.f32.mxu1 %vm2186_vm0, %v2185_v0  ;;  %v569_v2 = vld [vmem:[#allocation8 + $0x78] sm:$0xff]  ;;  %v568_v4 = vld [vmem:[#allocation8 + $0x70] sm:$0xff]  ;;  %v405_v5 = vld [vmem:[#allocation7 + $0x68] sm:$0xff]  ;;  %v2187_v50 = vmov 1966171168   ;;  %vm851_vm1 = vcmask 130112  }
  0x84   : > { %1739 = vmatprep.subr.mxu0 %v407_v1  ;;  %1796 = vmatpush3.msra.mxu1 %v569_v2  ;;  %v567_v6 = vld [vmem:[#allocation8 + $0x68] sm:$0xff]  ;;  %v404_v7 = vld [vmem:[#allocation7 + $0x60] sm:$0xff]  ;;  %v403_v9 = vld [vmem:[#allocation7 + $0x58] sm:$0xff]  ;;  %v650_v51 = vunpack.c.l.s4 %v2187_v50  ;;  %v2517_v54 = vshrl.u32 %v652_v52, 7  ;;  %vm916_vm2 = vcmask 1041409   ;;  %vm918_vm3 = vcmask 1042434  }
  0x85   : > { %1740 = vmatpush3.msra.mxu0 %v407_v1  ;;  %1797 = vmatprep.subr.mxu1 %v2185_v0  ;;  %v566_v8 = vld [vmem:[#allocation8 + $0x60] sm:$0xff]  ;;  %v565_v10 = vld [vmem:[#allocation8 + $0x58] sm:$0xff]  ;;  %v402_v11 = vld [vmem:[#allocation7 + $0x50] sm:$0xff]  ;;  %vm920_vm4 = vcmask 1043459   ;;  %vm922_vm5 = vcmask 1044484   ;;  %vm924_vm6 = vcmask 1045509  }
  0x86   : > { %1741 = vmatprep.subr.mxu0 %v406_v3  ;;  %1798 = vmatpush3.msra.mxu1 %v568_v4  ;;  %v564_v12 = vld [vmem:[#allocation8 + $0x50] sm:$0xff]  ;;  %v401_v13 = vld [vmem:[#allocation7 + $0x48] sm:$0xff]  ;;  %v400_v15 = vld [vmem:[#allocation7 + $0x40] sm:$0xff]  ;;  %v651_v53 = vunpack.c.0.s8 %v650_v51  ;;  %v2524_v63 = vsub.s32 0, %v2517_v54  ;;  %vm926_vm7 = vcmask 1046534   ;;  %vm928_vm8 = vcmask 1047559  }
  0x87   : > { %1742 = vmatpush3.msra.mxu0 %v406_v3  ;;  %1799 = vmatprep.subr.mxu1 %v2185_v0  ;;  %v563_v14 = vld [vmem:[#allocation8 + $0x48] sm:$0xff]  ;;  %v562_v16 = vld [vmem:[#allocation8 + $0x40] sm:$0xff]  ;;  %v399_v17 = vld [vmem:[#allocation7 + $0x38] sm:$0xff]  ;;  %vm931_vm9 = vcmask 130048   ;;  %s1684_s22 = sshll.u32 %s2252_s28, 7  ;;  %s374_s2 = scalar_lea.vmem [#allocation11], %s2418_s9 }
  0x88   : > { %1743 = vmatprep.subr.mxu0 %v405_v5  ;;  %1800 = vmatpush3.msra.mxu1 %v567_v6  ;;  %v561_v18 = vld [vmem:[#allocation8 + $0x38] sm:$0xff]  ;;  %v398_v19 = vld [vmem:[#allocation7 + $0x30] sm:$0xff]  ;;  %v397_v21 = vld [vmem:[#allocation7 + $0x28] sm:$0xff]  ;;  %v654_v56 = vsub.s32 %v651_v53, %v2517_v54  ;;  %s1518_s13 = sshll.u32 %s374_s2, 4  ;;  %s2851_s19 = scalar_lea.hbm %s2936_s7, %s1684_s22  ;;  %s2853_s13 = int_to_ptr.vmem [resolvable:$true] %s1518_s13 }
  0x89   : > { %1744 = vmatpush3.msra.mxu0 %v405_v5  ;;  %1801 = vmatprep.subr.mxu1 %v2185_v0  ;;  %v560_v20 = vld [vmem:[#allocation8 + $0x30] sm:$0xff]  ;;  %v559_v22 = vld [vmem:[#allocation8 + $0x28] sm:$0xff]  ;;  %v396_v23 = vld [vmem:[#allocation7 + $0x20] sm:$0xff]  ;;  %s1492_s21 = scalar_lea.sflag [#allocation12], %s2406_s26  ;;  %s2071_s16 = scalar_lea.vmem %s2853_s13, 128 }
  0x8a   : > { %1745 = vmatprep.subr.mxu0 %v404_v7  ;;  %1802 = vmatpush3.msra.mxu1 %v566_v8  ;;  %v558_v24 = vld [vmem:[#allocation8 + $0x20] sm:$0xff]  ;;  %v395_v25 = vld [vmem:[#allocation7 + $0x18] sm:$0xff]  ;;  %v394_v27 = vld [vmem:[#allocation7 + $0x10] sm:$0xff]  ;;  %p2072_p0 = scmp.ne.s32.totalorder %s2853_s13, %s2071_s16  ;;  %p2974_p10 = scmp.ne.s32.totalorder %s2957_s11, 0 }
  0x8b   : > { %1746 = vmatpush3.msra.mxu0 %v404_v7  ;;  %1803 = vmatprep.subr.mxu1 %v2185_v0  ;;  %v557_v26 = vld [vmem:[#allocation8 + $0x18] sm:$0xff]  ;;  %v556_v28 = vld [vmem:[#allocation8 + $0x10] sm:$0xff]  ;;  %v393_v29 = vld [vmem:[#allocation7 + $0x8] sm:$0xff]  ;;  %s2189_s14 = smov [#allocation11]  }
  0x8c   : > { %1747 = vmatprep.subr.mxu0 %v403_v9  ;;  %1804 = vmatpush3.msra.mxu1 %v565_v10  ;;  %v555_v30 = vld [vmem:[#allocation8 + $0x8] sm:$0xff]  ;;  %v392_v31 = vld [vmem:[#allocation7] sm:$0xff]  ;;  %v2450_v33 = vld [vmem:[%s2410_s15] sm:$0xff]  ;;  %p2073_p3 = pnand %p2072_p0, %p2974_p10 }
  0x8d   : > { %1748 = vmatpush3.msra.mxu0 %v403_v9  ;;  %1805 = vmatprep.subr.mxu1 %v2185_v0  ;;  %v554_v32 = vld [vmem:[#allocation8] sm:$0xff]  ;;  %v553_v34 = vld [vmem:[%s326_s29] sm:$0xff]  ;;  %v2465_v37 = vld [vmem:[%s2410_s15 + $0x18] sm:$0xff] }
  0x8e   : > { %1749 = vmatprep.subr.mxu0 %v402_v11  ;;  %1806 = vmatpush3.msra.mxu1 %v564_v12  ;;  %v2456_v35 = vld [vmem:[%s2410_s15 + $0x8] sm:$0xff]  ;;  %v2459_v36 = vld [vmem:[%s2410_s15 + $0x10] sm:$0xff]  ;;  %v2468_v38 = vld [vmem:[%s2410_s15 + $0x20] sm:$0xff]  ;;  %p2074_p11 = pneg %p2073_p3 }
  0x8f   : > { %1750 = vmatpush3.msra.mxu0 %v402_v11  ;;  %1807 = vmatprep.subr.mxu1 %v2185_v0  ;;  %v2473_v39 = vld [vmem:[%s2410_s15 + $0x28] sm:$0xff]  ;;  %v2476_v40 = vld [vmem:[%s2410_s15 + $0x30] sm:$0xff]  ;;  %v2481_v41 = vld [vmem:[%s2410_s15 + $0x38] sm:$0xff] }
  0x90   : > { %1751 = vmatprep.subr.mxu0 %v401_v13  ;;  %1808 = vmatpush3.msra.mxu1 %v563_v14  ;;  %v2484_v42 = vld [vmem:[%s2410_s15 + $0x40] sm:$0xff]  ;;  %v2489_v43 = vld [vmem:[%s2410_s15 + $0x48] sm:$0xff]  ;;  %v2492_v44 = vld [vmem:[%s2410_s15 + $0x50] sm:$0xff] }
  0x91   : > { %1752 = vmatpush3.msra.mxu0 %v401_v13  ;;  %1809 = vmatprep.subr.mxu1 %v2185_v0  ;;  %v2497_v45 = vld [vmem:[%s2410_s15 + $0x58] sm:$0xff]  ;;  %v2500_v46 = vld [vmem:[%s2410_s15 + $0x60] sm:$0xff]  ;;  %v2505_v47 = vld [vmem:[%s2410_s15 + $0x68] sm:$0xff] }
  0x92   : > { %1753 = vmatprep.subr.mxu0 %v400_v15  ;;  %1810 = vmatpush3.msra.mxu1 %v562_v16  ;;  %v2508_v48 = vld [vmem:[%s2410_s15 + $0x70] sm:$0xff]  ;;  %v2513_v49 = vld [vmem:[%s2410_s15 + $0x78] sm:$0xff]  ;;  %v1680_v55 = vld [vmem:[%s2933_s4] ss:$0 sm:$0xff]  ;;  %s2075_s15 = sshll.u32 %s2189_s14, 4  ;;  %s2076_s15 = int_to_ptr.vmem [resolvable:$false] %s2075_s15 }
  0x93   : > { %1754 = vmatpush3.msra.mxu0 %v400_v15  ;;  %1811 = vmatprep.subr.mxu1 %v2185_v0  ;;  %v2532_v15 = vld [vmem:[%s2934_s5] ss:$0 sm:$0xff]  ;;  %s2077_s0 = scalar_lea.vmem %s2076_s15, 256  ;;  %p2078_p9 = scmp.lt.s32.totalorder %s2853_s13, %s2076_s15 }
  0x94   : > { %1755 = vmatprep.subr.mxu0 %v399_v17  ;;  %1812 = vmatpush3.msra.mxu1 %v561_v18  ;;  %p2079_p13 = scmp.lt.s32.totalorder %s2077_s0, %s2071_s16 }
  0x95   : > { %1756 = vmatpush3.msra.mxu0 %v399_v17  ;;  %1813 = vmatprep.subr.mxu1 %v2185_v0 }
  0x96   : > { %1757 = vmatprep.subr.mxu0 %v398_v19  ;;  %1814 = vmatpush3.msra.mxu1 %v560_v20  ;;  %p2080_p1 = por %p2079_p13, %p2078_p9 }
  0x97   : > { %1758 = vmatpush3.msra.mxu0 %v398_v19  ;;  %1815 = vmatprep.subr.mxu1 %v2185_v0 }
  0x98   : > { %1759 = vmatprep.subr.mxu0 %v397_v21  ;;  %1816 = vmatpush3.msra.mxu1 %v559_v22  ;;  %p2081_p4 = pnand %p2080_p1, %p2074_p11 }
  0x99   : > { %1760 = vmatpush3.msra.mxu0 %v397_v21  ;;  %1817 = vmatprep.subr.mxu1 %v2185_v0 }
  0x9a   : > { %1761 = vmatprep.subr.mxu0 %v396_v23  ;;  %1818 = vmatpush3.msra.mxu1 %v558_v24 }
  0x9b   : > { %1762 = vmatpush3.msra.mxu0 %v396_v23  ;;  %1819 = vmatprep.subr.mxu1 %v2185_v0 }
  0x9c   : > { %1763 = vmatprep.subr.mxu0 %v395_v25  ;;  %1820 = vmatpush3.msra.mxu1 %v557_v26 }
  0x9d   : > { %1764 = vmatpush3.msra.mxu0 %v395_v25  ;;  %1821 = vmatprep.subr.mxu1 %v2185_v0 }
  0x9e   : > { %1765 = vmatprep.subr.mxu0 %v394_v27  ;;  %1822 = vmatpush3.msra.mxu1 %v556_v28 }
  0x9f   : > { %1766 = vmatpush3.msra.mxu0 %v394_v27  ;;  %1823 = vmatprep.subr.mxu1 %v2185_v0 }
  0xa0   : > { %1767 = vmatprep.subr.mxu0 %v393_v29  ;;  %1824 = vmatpush3.msra.mxu1 %v555_v30 }
  0xa1   : > { %1768 = vmatpush3.msra.mxu0 %v393_v29  ;;  %1825 = vmatprep.subr.mxu1 %v2185_v0 }
  0xa2   : > { %1769 = vmatprep.subr.mxu0 %v392_v31  ;;  %1826 = vmatpush3.msra.mxu1 %v554_v32 }
  0xa3   : > { %1770 = vmatpush3.msra.mxu0 %v392_v31  ;;  %1771 = vmatprep.mubr.f32.mxu0 %v2450_v33 }
  0xa4   : > { %1828 = vmatmul.mubr.f32.vlgmr.msra.gmra.mxu1 %v553_v34  ;;  %1772 = vmatmul.mubr.f32.vlgmr.msra.gmra.mxu0 %v2456_v35 }
  0xa5   : > { %1774 = vmatprep.mubr.f32.mxu0 %v2459_v36 }
  0xa8   : > { %1775 = vmatmul.mubr.f32.gmra.mxu0 %v2465_v37 }
  0xa9   : > { %1777 = vmatprep.mubr.f32.mxu0 %v2468_v38 }
  0xac   : > { %1778 = vmatmul.mubr.f32.gmra.mxu0 %v2473_v39 }
  0xad   : > { %1780 = vmatprep.mubr.f32.mxu0 %v2476_v40 }
  0xb0   : > { %1781 = vmatmul.mubr.f32.gmra.mxu0 %v2481_v41 }
  0xb1   : > { %1783 = vmatprep.mubr.f32.mxu0 %v2484_v42 }
  0xb4   : > { %1784 = vmatmul.mubr.f32.gmra.mxu0 %v2489_v43 }
  0xb5   : > { %1786 = vmatprep.mubr.f32.mxu0 %v2492_v44 }
  0xb8   : > { %1787 = vmatmul.mubr.f32.gmra.mxu0 %v2497_v45 }
  0xb9   : > { %1789 = vmatprep.mubr.f32.mxu0 %v2500_v46 }
  0xbc   : > { %1790 = vmatmul.mubr.f32.gmra.mxu0 %v2505_v47 }
  0xbd   : > { %1792 = vmatprep.mubr.f32.mxu0 %v2508_v48 }
  0xc0   : > { %1793 = vmatmul.mubr.f32.gmra.mxu0 %v2513_v49 }
 0x164   : > { %v643_v57 = vpop.f32.mrf.mxu1  ;;  %v1773_v58 = vpop.f32.mrf.mxu0 }
 0x165   : > { %v644_v59 = vadd.f32 %v1680_v55, %v643_v57 }
 0x166   : > { %v1829_v60 = vpop.f32.mrf.mxu1  ;;  %v474_v61 = vpop.f32.mrf.mxu0 }
 0x167   : > { %v655_v62 = vrot.slane %v644_v59, %v654_v56  ;;  %v648_v3 = vcombine.high %v644_v59, %v644_v59 }
 0x168   : > { %v1776_v0 = vpop.f32.mrf.mxu0 }
 0x169   : > { %v663_v1 = vcombine.high %v655_v62, %v655_v62  ;;  %v671_v2 = vrot.slane %v655_v62, %v654_v56  ;;  %v662_v13 = vrot.slane %v648_v3, %v654_v56 }
 0x16a   : > { %v484_v4 = vpop.f32.mrf.mxu0 }
 0x16b   : > { %v700_v5 = vrot.slane %v671_v2, %v2524_v63  ;;  %v685_v6 = vrot.slane %v663_v1, %v654_v56  ;;  %v693_v7 = vcombine.high %v671_v2, %v671_v2  ;;  %v678_v26 = vrot.slane %v662_v13, %v654_v56 }
 0x16c   : > { %v1779_v8 = vpop.f32.mrf.mxu0  ;;  %v664_v27 = vcombine.high %v662_v13, %v662_v13 }
 0x16d   : > { %v738_v9 = vadd.f32 %v1773_v58, %v700_v5  ;;  %v737_v10 = vadd.f32 %v700_v5, %v474_v61  ;;  %v704_v11 = vrot.slane %v685_v6, %v2524_v63  ;;  %v708_v12 = vrot.slane %v693_v7, %v2524_v63 }
 0x16e   : > { %v494_v14 = vpop.f32.mrf.mxu0  ;;  %v695_v19 = vcombine.high %v685_v6, %v685_v6  ;;  %v716_v53 = vrot.slane %v678_v26, %v2524_v63  ;;  %v692_v60 = vrot.slane %v664_v27, %v654_v56  ;;  %v694_v3 = vcombine.high %v678_v26, %v678_v26 }
 0x16f   : > { %v753_v16 = vmax.f32 %v737_v10, 0.0  ;;  %v740_v17 = vadd.f32 %v1776_v0, %v704_v11  ;;  %v739_v18 = vadd.f32 %v704_v11, %v484_v4  ;;  %v754_v21 = vmax.f32 %v738_v9, 0.0 }
 0x170   : > { %v1782_v20 = vpop.f32.mrf.mxu0  ;;  %v741_v23 = vadd.f32 %v708_v12, %v494_v14  ;;  %v742_v29 = vadd.f32 %v1779_v8, %v708_v12  ;;  %v712_v30 = vrot.slane %v695_v19, %v2524_v63  ;;  %v720_v6 = vrot.slane %v692_v60, %v2524_v63 }
 0x171   : > { %v755_v22 = vmax.f32 %v739_v18, 0.0  ;;  %v776_v24 = vmul.f32 %v2532_v15, %v753_v16  ;;  %v756_v28 = vmax.f32 %v740_v17, 0.0  ;;  %v777_v51 = vmul.f32 %v2532_v15, %v754_v21 }
 0x172   : > { %v504_v25 = vpop.f32.mrf.mxu0  ;;  %v757_v34 = vmax.f32 %v741_v23, 0.0  ;;  %v758_v57 = vmax.f32 %v742_v29, 0.0  ;;  %v744_v58 = vadd.f32 %v1782_v20, %v712_v30  ;;  %v724_v11 = vrot.slane %v694_v3, %v2524_v63 }
 0x173   : > { %792 = vadd.xlane.f32.xlu0 %v776_v24  ;;  %v778_v31 = vmul.f32 %v2532_v15, %v755_v22  ;;  %v743_v50 = vadd.f32 %v712_v30, %v504_v25  ;;  %v779_v59 = vmul.f32 %v2532_v15, %v756_v28  ;;  %v696_v17 = vcombine.high %v692_v60, %v692_v60 }
 0x174   : > { %v1785_v32 = vpop.f32.mrf.mxu0  ;;  %v780_v1 = vmul.f32 %v2532_v15, %v757_v34  ;;  %v760_v4 = vmax.f32 %v744_v58, 0.0  ;;  %v781_v7 = vmul.f32 %v2532_v15, %v758_v57 }
 0x175   : > { %796 = vadd.xlane.f32.xlu1 %v778_v31  ;;  %v759_v62 = vmax.f32 %v743_v50, 0.0  ;;  %v746_v5 = vadd.f32 %v1785_v32, %v716_v53  ;;  %v728_v25 = vrot.slane %v696_v17, %v2524_v63 }
 0x176   : > { %v514_v55 = vpop.f32.mrf.mxu0  ;;  %v783_v16 = vmul.f32 %v2532_v15, %v760_v4 }
 0x177   : > { %794 = vadd.xlane.f32.xlu0 %v777_v51  ;;  %v745_v0 = vadd.f32 %v716_v53, %v514_v55  ;;  %v782_v56 = vmul.f32 %v2532_v15, %v759_v62  ;;  %v762_v13 = vmax.f32 %v746_v5, 0.0 }
 0x178   : > { %v1788_v61 = vpop.f32.mrf.mxu0 }
 0x179   : > { %798 = vadd.xlane.f32.xlu1 %v779_v59  ;;  %v761_v9 = vmax.f32 %v745_v0, 0.0  ;;  %v748_v14 = vadd.f32 %v1788_v61, %v720_v6  ;;  %v785_v26 = vmul.f32 %v2532_v15, %v762_v13 }
 0x17a   : > { %v524_v2 = vpop.f32.mrf.mxu0 }
 0x17b   : > { %800 = vadd.xlane.f32.xlu0 %v780_v1  ;;  %v747_v10 = vadd.f32 %v720_v6, %v524_v2  ;;  %v784_v21 = vmul.f32 %v2532_v15, %v761_v9  ;;  %v764_v23 = vmax.f32 %v748_v14, 0.0  ;;  %v841_v2 = vand.u32 127, %v652_v52 }
 0x17c   : > { %v1791_v8 = vpop.f32.mrf.mxu0 }
 0x17d   : > { %802 = vadd.xlane.f32.xlu1 %v781_v7  ;;  %v763_v19 = vmax.f32 %v747_v10, 0.0  ;;  %v750_v24 = vadd.f32 %v1791_v8, %v724_v11  ;;  %v787_v32 = vmul.f32 %v2532_v15, %v764_v23  ;;  %v2582_v8 = vsub.s32 %v841_v2, %v2517_v54 }
 0x17e   : > { %v534_v12 = vpop.f32.mrf.mxu0 }
 0x17f   : > { %804 = vadd.xlane.f32.xlu0 %v782_v56  ;;  %v749_v20 = vadd.f32 %v724_v11, %v534_v12  ;;  %v786_v29 = vmul.f32 %v2532_v15, %v763_v19  ;;  %v766_v30 = vmax.f32 %v750_v24, 0.0 }
 0x180   : > { %v1794_v18 = vpop.f32.mrf.mxu0 }
 0x181   : > { %806 = vadd.xlane.f32.xlu1 %v783_v16  ;;  %v765_v27 = vmax.f32 %v749_v20, 0.0  ;;  %v752_v31 = vadd.f32 %v1794_v18, %v728_v25  ;;  %v789_v53 = vmul.f32 %v2532_v15, %v766_v30 }
 0x182   : > { %v544_v22 = vpop.f32.mrf.mxu0 }
 0x183   : > { %808 = vadd.xlane.f32.xlu0 %v784_v21  ;;  %v751_v28 = vadd.f32 %v728_v25, %v544_v22  ;;  %v788_v50 = vmul.f32 %v2532_v15, %v765_v27  ;;  %v768_v51 = vmax.f32 %v752_v31, 0.0 }
 0x185   : > { %810 = vadd.xlane.f32.xlu1 %v785_v26  ;;  %v767_v34 = vmax.f32 %v751_v28, 0.0  ;;  %v791_v57 = vmul.f32 %v2532_v15, %v768_v51 }
 0x187   : > { %812 = vadd.xlane.f32.xlu0 %v786_v29  ;;  %v790_v55 = vmul.f32 %v2532_v15, %v767_v34  ;;  %v846_v15 = vadd.s32 4294967288, %v841_v2 }
 0x189   : > { %814 = vadd.xlane.f32.xlu1 %v787_v32  ;;  %v2577_v6 = vsub.s32 %v846_v15, %v2517_v54 }
 0x18b   : > { %816 = vadd.xlane.f32.xlu0 %v788_v50 }
 0x18d   : > { %818 = vadd.xlane.f32.xlu1 %v789_v53 }
 0x18f   : > { %820 = vadd.xlane.f32.xlu0 %v790_v55 }
 0x191   : > { %822 = vadd.xlane.f32.xlu1 %v791_v57 }
 0x1fc   : > { %v2555_v58 = vpop.xlane.xlu0 %792 }
 0x1fd   : > { %v845_v17 = vrot.slane %v2555_v58, %v2582_v8 }
 0x1fe   : > { %v2557_v59 = vpop.xlane.xlu1 %796 }
 0x1ff   : > { %v856_v56 = vrot.slane %v2557_v59, %v2582_v8 }
 0x200   : > { %v2559_v60 = vpop.xlane.xlu0 %794 }
 0x201   : > { %v850_v11 = vrot.slane %v2559_v60, %v2577_v6 }
 0x202   : > { %v2561_v61 = vpop.xlane.xlu1 %798 }
 0x203   : > { %v860_v9 = vrot.slane %v2561_v61, %v2577_v6  ;;  %v852_v24 = vsel %vm851_vm1, %v850_v11, %v845_v17 }
 0x204   : > { %v2563_v62 = vpop.xlane.xlu0 %800 }
 0x205   : > { %v865_v13 = vrot.slane %v2563_v62, %v2582_v8  ;;  %v861_v18 = vsel %vm851_vm1, %v860_v9, %v856_v56 }
 0x206   : > { %v2565_v0 = vpop.xlane.xlu1 %802  ;;  %v917_v28 = vsel %vm916_vm2, %v861_v18, %v852_v24 }
 0x207   : > { %v869_v52 = vrot.slane %v2565_v0, %v2577_v6 }
 0x208   : > { %v2567_v1 = vpop.xlane.xlu0 %804 }
 0x209   : > { %v874_v19 = vrot.slane %v2567_v1, %v2582_v8  ;;  %v870_v21 = vsel %vm851_vm1, %v869_v52, %v865_v13  ;;  %v942_v13 = vsub.s32 1, %v2517_v54 }
 0x20a   : > { %v2570_v3 = vpop.xlane.xlu1 %806  ;;  %v919_v32 = vsel %vm918_vm3, %v870_v21, %v917_v28 }
 0x20b   : > { %v878_v12 = vrot.slane %v2570_v3, %v2577_v6 }
 0x20c   : > { %v2572_v4 = vpop.xlane.xlu0 %808 }
 0x20d   : > { %v883_v22 = vrot.slane %v2572_v4, %v2582_v8  ;;  %v879_v25 = vsel %vm851_vm1, %v878_v12, %v874_v19  ;;  %v2188_v12 = vmov 0   ;;  %v2945_v19 = vsub.s32 5, %v2517_v54 }
 0x20e   : > { %v2574_v5 = vpop.xlane.xlu1 %810  ;;  %v921_v50 = vsel %vm920_vm4, %v879_v25, %v919_v32  ;;  %1914 = vset.pattern.permute.xlu0 %v2188_v12  ;;  %1913 = vset.pattern.permute.xlu1 %v2188_v12  ;;  %v2944_v25 = vsub.s32 6, %v2517_v54 }
 0x20f   : > { %v887_v14 = vrot.slane %v2574_v5, %v2577_v6 }
 0x210   : > { %v2579_v7 = vpop.xlane.xlu0 %812 }
 0x211   : > { %v892_v26 = vrot.slane %v2579_v7, %v2582_v8  ;;  %v888_v29 = vsel %vm851_vm1, %v887_v14, %v883_v22  ;;  %v946_v22 = vsub.s32 2, %v2517_v54 }
 0x212   : > { %v2588_v10 = vpop.xlane.xlu1 %814  ;;  %v923_v2 = vsel %vm922_vm5, %v888_v29, %v921_v50 }
 0x213   : > { %v896_v20 = vrot.slane %v2588_v10, %v2577_v6 }
 0x214   : > { %v2600_v16 = vpop.xlane.xlu0 %816 }
 0x215   : > { %v901_v30 = vrot.slane %v2600_v16, %v2582_v8  ;;  %v897_v34 = vsel %vm851_vm1, %v896_v20, %v892_v26 }
 0x216   : > { %v2612_v23 = vpop.xlane.xlu1 %818  ;;  %v925_v15 = vsel %vm924_vm6, %v897_v34, %v923_v2  ;;  %v2946_v34 = vsub.s32 3, %v2517_v54 }
 0x217   : > { %v905_v27 = vrot.slane %v2612_v23, %v2577_v6 }
 0x218   : > { %v2624_v31 = vpop.xlane.xlu0 %820 }
 0x219   : > { %v906_v53 = vsel %vm851_vm1, %v905_v27, %v901_v30  ;;  %v910_v55 = vrot.slane %v2624_v31, %v2582_v8 }
 0x21a   : > { %v2629_v51 = vpop.xlane.xlu1 %822  ;;  %v927_v52 = vsel %vm926_vm7, %v906_v53, %v925_v15 }
 0x21b   : > { %v914_v57 = vrot.slane %v2629_v51, %v2577_v6 }
 0x21d   : > { %v915_v9 = vsel %vm851_vm1, %v914_v57, %v910_v55 }
 0x21e   : > { %v929_v56 = vsel %vm928_vm8, %v915_v9, %v927_v52 }
 0x21f   : > { %v932_v11 = vsel %vm931_vm9, %v929_v56, -inf }
 0x220   : > { %933 = vmax.xlane.f32.xlu0 %v932_v11 }
 0x2a9   : > { %v934_v14 = vpop.xlane.xlu0 %933 }
 0x2aa   : > { %v939_v17 = vrot.slane %v934_v14, %v2524_v63  ;;  %v943_v18 = vrot.slane %v934_v14, %v942_v13  ;;  %v2654_v26 = vrot.slane %v934_v14, %v2945_v19  ;;  %v947_v29 = vrot.slane %v934_v14, %v946_v22 }
 0x2ab   : > { %v951_v2 = vrot.slane %v934_v14, %v2946_v34 }
 0x2ac   : > { %v976_v20 = vsub.f32 %v2555_v58, %v939_v17  ;;  %v977_v21 = vsub.f32 %v2559_v60, %v939_v17  ;;  %v978_v24 = vsub.f32 %v2557_v59, %v943_v18  ;;  %v979_v30 = vsub.f32 %v2561_v61, %v943_v18 }
 0x2ad   : > { %v966_v60 = vsub.s32 7, %v2517_v54  ;;  %v963_v59 = vrot.slane %v934_v14, %v2944_v25  ;;  %v986_v32 = vsub.f32 %v2579_v7, %v2654_v26  ;;  %v980_v50 = vsub.f32 %v2563_v62, %v947_v29 }
 0x2ae   : > { %v992_v27 = vmul.f32 1.442695, %v976_v20  ;;  %v994_v28 = vmul.f32 1.442695, %v977_v21  ;;  %v996_v58 = vmul.f32 1.442695, %v978_v24  ;;  %v981_v15 = vsub.f32 %v2565_v0, %v947_v29 }
 0x2af   : > { %v998_v53 = vmul.f32 1.442695, %v979_v30  ;;  %v967_v61 = vrot.slane %v934_v14, %v966_v60  ;;  %v988_v55 = vsub.f32 %v2600_v16, %v963_v59  ;;  %v1012_v57 = vmul.f32 1.442695, %v986_v32 }
 0x2b0   : > { %1915 = vpow2.f32 %v992_v27  ;;  %v1000_v9 = vmul.f32 1.442695, %v980_v50  ;;  %v954_v62 = vsub.s32 4, %v2517_v54  ;;  %v982_v56 = vsub.f32 %v2567_v1, %v951_v2 }
 0x2b1   : > { %1917 = vpow2.f32 %v994_v28  ;;  %v990_v7 = vsub.f32 %v2624_v31, %v967_v61  ;;  %v1016_v52 = vmul.f32 1.442695, %v988_v55  ;;  %v1002_v11 = vmul.f32 1.442695, %v981_v15 }
 0x2b2   : > { %1919 = vpow2.f32 %v996_v58  ;;  %v955_v0 = vrot.slane %v934_v14, %v954_v62  ;;  %v983_v31 = vsub.f32 %v2570_v3, %v951_v2  ;;  %v1004_v18 = vmul.f32 1.442695, %v982_v56 }
 0x2b3   : > { %1921 = vpow2.f32 %v998_v53  ;;  %v1020_v17 = vmul.f32 1.442695, %v990_v7  ;;  %v989_v32 = vsub.f32 %v2612_v23, %v963_v59 }
 0x2b4   : > { %1923 = vpow2.f32 %v1012_v57  ;;  %v984_v20 = vsub.f32 %v2572_v4, %v955_v0  ;;  %v1006_v21 = vmul.f32 1.442695, %v983_v31  ;;  %v985_v14 = vsub.f32 %v2574_v5, %v955_v0 }
 0x2b5   : > { %1925 = vpow2.f32 %v1000_v9  ;;  %v987_v4 = vsub.f32 %v2588_v10, %v2654_v26  ;;  %v991_v10 = vsub.f32 %v2629_v51, %v967_v61  ;;  %v1018_v26 = vmul.f32 1.442695, %v989_v32 }
 0x2b6   : > { %1927 = vpow2.f32 %v1016_v52  ;;  %v1008_v3 = vmul.f32 1.442695, %v984_v20  ;;  %v1010_v30 = vmul.f32 1.442695, %v985_v14 }
 0x2b7   : > { %1929 = vpow2.f32 %v1002_v11  ;;  %v1014_v50 = vmul.f32 1.442695, %v987_v4  ;;  %v1022_v57 = vmul.f32 1.442695, %v991_v10 }
 0x2b8   : > { %1931 = vpow2.f32 %v1020_v17 }
 0x2b9   : > { %1933 = vpow2.f32 %v1004_v18 }
 0x2ba   : > { %1935 = vpow2.f32 %v1006_v21 }
 0x2bb   : > { %1937 = vpow2.f32 %v1008_v3 }
 0x2bc   : > { %1939 = vpow2.f32 %v1010_v30 }
 0x2bd   : > { %v2675_v12 = vpop.eup %1915  ;;  %1941 = vpow2.f32 %v1014_v50 }
 0x2be   : > { %v2677_v16 = vpop.eup %1917  ;;  %1041 = vperm.xlu1 %1913, %v2675_v12   ;;  %1943 = vpow2.f32 %v1018_v26 }
 0x2bf   : > { %1044 = vperm.xlu0 %1914, %v2677_v16   ;;  %v2684_v1 = vpop.eup %1919  ;;  %1945 = vpow2.f32 %v1022_v57 }
 0x2c0   : > { %v2688_v24 = vpop.eup %1921 }
 0x2c1   : > { %v2691_v27 = vpop.eup %1923 }
 0x2c2   : > { %1047 = vperm.xlu1 %1913, %v2684_v1   ;;  %v2695_v28 = vpop.eup %1925 }
 0x2c3   : > { %1071 = vperm.xlu0 %1914, %v2691_v27   ;;  %v2698_v29 = vpop.eup %1927 }
 0x2c4   : > { %v2703_v58 = vpop.eup %1929 }
 0x2c5   : > { %v2706_v5 = vpop.eup %1931 }
 0x2c6   : > { %1050 = vperm.xlu1 %1913, %v2688_v24   ;;  %v2710_v53 = vpop.eup %1933 }
 0x2c7   : > { %1077 = vperm.xlu0 %1914, %v2698_v29   ;;  %v2714_v55 = vpop.eup %1935 }
 0x2c8   : > { %v2717_v2 = vpop.eup %1937 }
 0x2c9   : > { %v2720_v23 = vpop.eup %1939 }
 0x2ca   : > { %1053 = vperm.xlu1 %1913, %v2695_v28   ;;  %v2723_v59 = vpop.eup %1941 }
 0x2cb   : > { %1083 = vperm.xlu0 %1914, %v2706_v5   ;;  %v2726_v51 = vpop.eup %1943 }
 0x2cc   : > { %v2729_v61 = vpop.eup %1945 }
 0x2ce   : > { %1056 = vperm.xlu1 %1913, %v2703_v58  }
 0x2d2   : > { %1059 = vperm.xlu1 %1913, %v2710_v53  }
 0x2d6   : > { %1062 = vperm.xlu1 %1913, %v2714_v55  }
 0x2da   : > { %1065 = vperm.xlu1 %1913, %v2717_v2  }
 0x2de   : > { %1068 = vperm.xlu1 %1913, %v2720_v23  }
 0x2e2   : > { %1074 = vperm.xlu1 %1913, %v2723_v59  }
 0x2e6   : > { %1080 = vperm.xlu1 %1913, %v2726_v51  }
 0x2ea   : > { %1086 = vperm.xlu1 %1913, %v2729_v61  }
 0x339   : > { %v1042_v15 = vpop.permute.xlu1 %1041 }
 0x33a   : > { %v1045_v17 = vpop.permute.xlu0 %1044  ;;  %v1091_v32 = vrot.slane %v1042_v15, %v2582_v8 }
 0x33b   : > { %v1095_v30 = vrot.slane %v1045_v17, %v2577_v6 }
 0x33d   : > { %v1048_v9 = vpop.permute.xlu1 %1047  ;;  %v1096_v15 = vsel %vm851_vm1, %v1095_v30, %v1091_v32 }
 0x33e   : > { %v1072_v18 = vpop.permute.xlu0 %1071  ;;  %v1100_v50 = vrot.slane %v1048_v9, %v2582_v8 }
 0x33f   : > { %v1136_v9 = vrot.slane %v1072_v18, %v2582_v8 }
 0x341   : > { %v1051_v7 = vpop.permute.xlu1 %1050 }
 0x342   : > { %v1104_v21 = vrot.slane %v1051_v7, %v2577_v6  ;;  %v1078_v14 = vpop.permute.xlu0 %1077 }
 0x344   : > { %v1105_v25 = vsel %vm851_vm1, %v1104_v21, %v1100_v50 }
 0x345   : > { %v1054_v52 = vpop.permute.xlu1 %1053  ;;  %v1160_v21 = vsel %vm916_vm2, %v1105_v25, %v1096_v15 }
 0x346   : > { %v1109_v26 = vrot.slane %v1054_v52, %v2582_v8 }
 0x349   : > { %v1057_v56 = vpop.permute.xlu1 %1056 }
 0x34a   : > { %v1113_v3 = vrot.slane %v1057_v56, %v2577_v6 }
 0x34c   : > { %v1114_v56 = vsel %vm851_vm1, %v1113_v3, %v1109_v26 }
 0x34d   : > { %v1060_v11 = vpop.permute.xlu1 %1059  ;;  %v1161_v3 = vsel %vm918_vm3, %v1114_v56, %v1160_v21 }
 0x34e   : > { %v1118_v7 = vrot.slane %v1060_v11, %v2582_v8  ;;  %v1084_v11 = vpop.permute.xlu0 %1083 }
 0x34f   : > { %v1154_v32 = vrot.slane %v1084_v11, %v2582_v8 }
 0x351   : > { %v1063_v0 = vpop.permute.xlu1 %1062 }
 0x352   : > { %v1122_v10 = vrot.slane %v1063_v0, %v2577_v6 }
 0x354   : > { %v1123_v0 = vsel %vm851_vm1, %v1122_v10, %v1118_v7 }
 0x355   : > { %v1066_v31 = vpop.permute.xlu1 %1065  ;;  %v1162_v50 = vsel %vm920_vm4, %v1123_v0, %v1161_v3 }
 0x356   : > { %v1127_v17 = vrot.slane %v1066_v31, %v2582_v8 }
 0x359   : > { %v1069_v20 = vpop.permute.xlu1 %1068 }
 0x35a   : > { %v1131_v57 = vrot.slane %v1069_v20, %v2577_v6  ;;  %v1145_v20 = vrot.slane %v1078_v14, %v2582_v8 }
 0x35d   : > { %v1075_v4 = vpop.permute.xlu1 %1074 }
 0x35e   : > { %v1140_v19 = vrot.slane %v1075_v4, %v2577_v6  ;;  %v1132_v4 = vsel %vm851_vm1, %v1131_v57, %v1127_v17 }
 0x360   : > { %v1141_v31 = vsel %vm851_vm1, %v1140_v19, %v1136_v9 }
 0x361   : > { %v1081_v34 = vpop.permute.xlu1 %1080 }
 0x362   : > { %v1149_v52 = vrot.slane %v1081_v34, %v2577_v6  ;;  %v1163_v34 = vsel %vm922_vm5, %v1132_v4, %v1162_v50 }
 0x363   : > { %v1164_v25 = vsel %vm924_vm6, %v1141_v31, %v1163_v34 }
 0x364   : > { %v1150_v30 = vsel %vm851_vm1, %v1149_v52, %v1145_v20 }
 0x365   : > { %v1087_v18 = vpop.permute.xlu1 %1086  ;;  %v1165_v26 = vsel %vm926_vm7, %v1150_v30, %v1164_v25 }
 0x366   : > { %v1158_v14 = vrot.slane %v1087_v18, %v2577_v6 }
 0x368   : > { %v1159_v10 = vsel %vm851_vm1, %v1158_v14, %v1154_v32 }
 0x369   : > { %v1166_v57 = vsel %vm928_vm8, %v1159_v10, %v1165_v26 }
 0x36a   : > { %v1168_v19 = vsel %vm931_vm9, %v1166_v57, 0.0 }
 0x36b   : > { %1169 = vadd.xlane.f32.xlu0 %v1168_v19 }
 0x3f4   : > { %v1170_v7 = vpop.xlane.xlu0 %1169 }
 0x3f5   : > { %v1191_v56 = vrot.slane %v1170_v7, %v954_v62  ;;  %v1175_v17 = vrot.slane %v1170_v7, %v2524_v63  ;;  %v1203_v15 = vrot.slane %v1170_v7, %v966_v60  ;;  %v1179_v9 = vrot.slane %v1170_v7, %v942_v13 }
 0x3f6   : > { %v1183_v0 = vrot.slane %v1170_v7, %v946_v22  ;;  %v2971_v13 = vsub.s32 3, %v2517_v54 }
 0x3f7   : > { %1947 = vrcp.f32 %v1191_v56 }
 0x3f8   : > { %1949 = vrcp.f32 %v1175_v17  ;;  %v1187_v4 = vrot.slane %v1170_v7, %v2971_v13 }
 0x3f9   : > { %1951 = vrcp.f32 %v1203_v15 }
 0x3fa   : > { %1953 = vrcp.f32 %v1179_v9 }
 0x3fb   : > { %1955 = vrcp.f32 %v1183_v0 }
 0x3fc   : > { %1957 = vrcp.f32 %v1187_v4 }
 0x404   : > { %v1948_v52 = vpop.eup %1947 }
 0x405   : > { %v1950_v20 = vpop.eup %1949  ;;  %v1225_v21 = vmul.f32 %v1948_v52, %v2717_v2 }
 0x406   : > { %v1952_v62 = vpop.eup %1951  ;;  %v1213_v63 = vmul.f32 %v1950_v20, %v2675_v12  ;;  %v1214_v11 = vmul.f32 %v1950_v20, %v2677_v16 }
 0x407   : > { %1278 = vperm.xlu0 %1914, %v1225_v21   ;;  %v1234_v60 = vmul.f32 %v1952_v62, %v2706_v5  ;;  %v1954_v3 = vpop.eup %1953  ;;  %v2972_v5 = vsub.s32 5, %v2517_v54 }
 0x408   : > { %1238 = vperm.xlu1 %1913, %v1213_v63   ;;  %v1216_v22 = vmul.f32 %v1954_v3, %v2684_v1  ;;  %v1217_v2 = vmul.f32 %v1954_v3, %v2688_v24  ;;  %v1956_v12 = vpop.eup %1955  ;;  %v2973_v1 = vsub.s32 6, %v2517_v54 }
 0x409   : > { %v1219_v31 = vmul.f32 %v1956_v12, %v2695_v28  ;;  %v1195_v50 = vrot.slane %v1170_v7, %v2972_v5  ;;  %v1220_v16 = vmul.f32 %v1956_v12, %v2703_v58  ;;  %v1958_v30 = vpop.eup %1957  ;;  %v1226_v28 = vmul.f32 %v1948_v52, %v2720_v23 }
 0x40a   : > { %v1222_v18 = vmul.f32 %v1958_v30, %v2710_v53  ;;  %v1199_v32 = vrot.slane %v1170_v7, %v2973_v1  ;;  %v1223_v24 = vmul.f32 %v1958_v30, %v2714_v55  ;;  %v1235_v55 = vmul.f32 %v1952_v62, %v2729_v61 }
 0x40b   : > { %1308 = vperm.xlu0 %1914, %v1234_v60   ;;  %1959 = vrcp.f32 %v1195_v50 }
 0x40c   : > { %1243 = vperm.xlu1 %1913, %v1214_v11   ;;  %1961 = vrcp.f32 %v1199_v32 }
 0x410   : > { %1248 = vperm.xlu1 %1913, %v1216_v22  }
 0x414   : > { %1253 = vperm.xlu1 %1913, %v1217_v2  }
 0x418   : > { %1258 = vperm.xlu1 %1913, %v1219_v31   ;;  %v1960_v34 = vpop.eup %1959 }
 0x419   : > { %v1228_v14 = vmul.f32 %v1960_v34, %v2691_v27  ;;  %v1229_v58 = vmul.f32 %v1960_v34, %v2723_v59  ;;  %v1962_v25 = vpop.eup %1961 }
 0x41a   : > { %v1231_v53 = vmul.f32 %v1962_v25, %v2698_v29  ;;  %v1232_v54 = vmul.f32 %v1962_v25, %v2726_v51 }
 0x41c   : > { %1263 = vperm.xlu1 %1913, %v1220_v16  }
 0x420   : > { %1268 = vperm.xlu1 %1913, %v1222_v18  }
 0x424   : > { %1273 = vperm.xlu1 %1913, %v1223_v24  }
 0x428   : > { %1283 = vperm.xlu1 %1913, %v1226_v28  }
 0x42c   : > { %1288 = vperm.xlu1 %1913, %v1228_v14  }
 0x430   : > { %1293 = vperm.xlu1 %1913, %v1229_v58  }
 0x434   : > { %1298 = vperm.xlu1 %1913, %v1231_v53  }
 0x438   : > { %1303 = vperm.xlu1 %1913, %v1232_v54  }
 0x43c   : > { %1313 = vperm.xlu1 %1913, %v1235_v55  }
 0x482   : > { %v1279_v52 = vpop.permute.xlu0 %1278 }
 0x483   : > { %v1239_v10 = vpop.permute.xlu1 %1238 }
 0x484   : > { %v1316_v51 = vmul.f32 %v1239_v10, %v2450_v33  ;;  %v1408_v12 = vrot.slane %v1239_v10, %v2582_v8 }
 0x486   : > { %v1309_v31 = vpop.permute.xlu0 %1308 }
 0x487   : > { %v1244_v23 = vpop.permute.xlu1 %1243  ;;  %v1330_v34 = vmul.f32 %v1309_v31, %v2508_v48 }
 0x488   : > { %v1317_v29 = vmul.f32 %v1244_v23, %v2456_v35 }
 0x48a   : > { %v1332_v20 = vadd.f32 %v1317_v29, %v1316_v51 }
 0x48b   : > { %v1249_v26 = vpop.permute.xlu1 %1248 }
 0x48c   : > { %v1318_v17 = vmul.f32 %v1249_v26, %v2459_v36  ;;  %v1324_v36 = vmul.f32 %v1279_v52, %v2484_v42  ;;  %v1333_v33 = vrot.slane %v1332_v20, 4  ;;  %v1444_v42 = vrot.slane %v1279_v52, %v2582_v8 }
 0x48e   : > { %v1334_v5 = vadd.f32 %v1333_v33, %v1332_v20  ;;  %v1471_v20 = vrot.slane %v1309_v31, %v2582_v8 }
 0x48f   : > { %v1254_v57 = vpop.permute.xlu1 %1253 }
 0x490   : > { %v1319_v59 = vmul.f32 %v1254_v57, %v2465_v37  ;;  %v1335_v53 = vrot.slane %v1334_v5, 2 }
 0x492   : > { %v1339_v15 = vadd.f32 %v1319_v59, %v1318_v17 }
 0x493   : > { %v1259_v19 = vpop.permute.xlu1 %1258 }
 0x494   : > { %v1320_v21 = vmul.f32 %v1259_v19, %v2468_v38  ;;  %v1340_v63 = vrot.slane %v1339_v15, 4  ;;  %v1412_v38 = vrot.slane %v1244_v23, %v2577_v6  ;;  %v1426_v58 = vrot.slane %v1259_v19, %v2582_v8 }
 0x496   : > { %v1413_v14 = vsel %vm851_vm1, %v1412_v38, %v1408_v12 }
 0x497   : > { %v1264_v27 = vpop.permute.xlu1 %1263 }
 0x498   : > { %v1321_v61 = vmul.f32 %v1264_v27, %v2473_v39  ;;  %v1341_v39 = vadd.f32 %v1340_v63, %v1339_v15  ;;  %v1430_v18 = vrot.slane %v1264_v27, %v2577_v6 }
 0x49a   : > { %v1346_v35 = vadd.f32 %v1321_v61, %v1320_v21  ;;  %v1342_v16 = vrot.slane %v1341_v39, 2 }
 0x49b   : > { %v1269_v7 = vpop.permute.xlu1 %1268 }
 0x49c   : > { %v1322_v62 = vmul.f32 %v1269_v7, %v2476_v40  ;;  %v1347_v4 = vrot.slane %v1346_v35, 4  ;;  %v1417_v40 = vrot.slane %v1249_v26, %v2582_v8  ;;  %v1435_v55 = vrot.slane %v1269_v7, %v2582_v8 }
 0x49d   : > { %v2821_v23 = vadd.f32 %v1342_v16, %v1341_v39  ;;  %v1431_v26 = vsel %vm851_vm1, %v1430_v18, %v1426_v58 }
 0x49e   : > { %v1348_v32 = vadd.f32 %v1347_v4, %v1346_v35 }
 0x49f   : > { %v1274_v56 = vpop.permute.xlu1 %1273 }
 0x4a0   : > { %v1323_v9 = vmul.f32 %v1274_v56, %v2481_v41  ;;  %v1421_v41 = vrot.slane %v1254_v57, %v2577_v6  ;;  %v1439_v28 = vrot.slane %v1274_v56, %v2577_v6  ;;  %v1349_v59 = vrot.slane %v1348_v32, 2 }
 0x4a2   : > { %v1353_v60 = vadd.f32 %v1323_v9, %v1322_v62  ;;  %v1422_v30 = vsel %vm851_vm1, %v1421_v41, %v1417_v40  ;;  %v1440_v56 = vsel %vm851_vm1, %v1439_v28, %v1435_v55  ;;  %v1350_v63 = vadd.f32 %v1349_v59, %v1348_v32 }
 0x4a3   : > { %v1284_v0 = vpop.permute.xlu1 %1283  ;;  %v1477_v54 = vsel %vm916_vm2, %v1422_v30, %v1413_v14 }
 0x4a4   : > { %v1325_v37 = vmul.f32 %v1284_v0, %v2489_v43  ;;  %v1354_v3 = vrot.slane %v1353_v60, 4  ;;  %v1478_v61 = vsel %vm918_vm3, %v1431_v26, %v1477_v54 }
 0x4a5   : > { %v1479_v21 = vsel %vm920_vm4, %v1440_v56, %v1478_v61 }
 0x4a6   : > { %v1360_v13 = vadd.f32 %v1325_v37, %v1324_v36  ;;  %v1355_v24 = vadd.f32 %v1354_v3, %v1353_v60 }
 0x4a7   : > { %v1289_v11 = vpop.permute.xlu1 %1288 }
 0x4a8   : > { %v1326_v43 = vmul.f32 %v1289_v11, %v2492_v44  ;;  %v1361_v50 = vrot.slane %v1360_v13, 4  ;;  %v1448_v44 = vrot.slane %v1284_v0, %v2577_v6  ;;  %v1356_v48 = vrot.slane %v1355_v24, 2 }
 0x4a9   : > { %v1453_v29 = vrot.slane %v1289_v11, %v2582_v8 }
 0x4aa   : > { %v1362_v10 = vadd.f32 %v1361_v50, %v1360_v13  ;;  %v1449_v19 = vsel %vm851_vm1, %v1448_v44, %v1444_v42  ;;  %v1357_v60 = vadd.f32 %v1356_v48, %v1355_v24  ;;  %v1344_v13 = vrot.slane %v2821_v23, 1 }
 0x4ab   : > { %v1294_v22 = vpop.permute.xlu1 %1293 }
 0x4ac   : > { %v1327_v2 = vmul.f32 %v1294_v22, %v2497_v45  ;;  %v1457_v27 = vrot.slane %v1294_v22, %v2577_v6  ;;  %v1363_v9 = vrot.slane %v1362_v10, 2 }
 0x4ae   : > { %v1367_v1 = vadd.f32 %v1327_v2, %v1326_v43  ;;  %v1458_v62 = vsel %vm851_vm1, %v1457_v27, %v1453_v29  ;;  %v1364_v39 = vadd.f32 %v1363_v9, %v1362_v10  ;;  %v1358_v2 = vrot.slane %v1357_v60, 1 }
 0x4af   : > { %v1299_v45 = vpop.permute.xlu1 %1298 }
 0x4b0   : > { %v1368_v25 = vrot.slane %v1367_v1, 4  ;;  %v1328_v15 = vmul.f32 %v1299_v45, %v2500_v46  ;;  %v1462_v52 = vrot.slane %v1299_v45, %v2582_v8  ;;  %v1336_v46 = vadd.f32 %v1335_v53, %v1334_v5 }
 0x4b1   : > { %v1365_v31 = vrot.slane %v1364_v39, 1 }
 0x4b2   : > { %v1369_v57 = vadd.f32 %v1368_v25, %v1367_v1  ;;  %v1337_v43 = vrot.slane %v1336_v46, 1 }
 0x4b3   : > { %v1304_v17 = vpop.permute.xlu1 %1303 }
 0x4b4   : > { %v1329_v7 = vmul.f32 %v1304_v17, %v2505_v47  ;;  %v1466_v51 = vrot.slane %v1304_v17, %v2577_v6  ;;  %v1370_v0 = vrot.slane %v1369_v57, 2  ;;  %v1480_v47 = vsel %vm922_vm5, %v1449_v19, %v1479_v21 }
 0x4b5   : > { %v1481_v4 = vsel %vm924_vm6, %v1458_v62, %v1480_v47 }
 0x4b6   : > { %v1374_v37 = vadd.f32 %v1329_v7, %v1328_v15  ;;  %v1467_v36 = vsel %vm851_vm1, %v1466_v51, %v1462_v52  ;;  %v1371_v41 = vadd.f32 %v1370_v0, %v1369_v57 }
 0x4b7   : > { %v1314_v35 = vpop.permute.xlu1 %1313  ;;  %v1482_v22 = vsel %vm926_vm7, %v1467_v36, %v1481_v4 }
 0x4b8   : > { %v1375_v11 = vrot.slane %v1374_v37, 4  ;;  %v1331_v8 = vmul.f32 %v1314_v35, %v2513_v49  ;;  %v1475_v33 = vrot.slane %v1314_v35, %v2577_v6  ;;  %v1351_v49 = vrot.slane %v1350_v63, 1 }
 0x4ba   : > { %v1376_v3 = vadd.f32 %v1375_v11, %v1374_v37  ;;  %v1381_v38 = vadd.f32 %v1331_v8, %v1330_v34  ;;  %v1476_v40 = vsel %vm851_vm1, %v1475_v33, %v1471_v20 }
 0x4bb   : > { %v1483_v6 = vsel %vm928_vm8, %v1476_v40, %v1482_v22 }
 0x4bc   : > { %v1377_v42 = vrot.slane %v1376_v3, 2  ;;  %v1382_v12 = vrot.slane %v1381_v38, 4  ;;  %1485 = vst.msk [vmem:[%s374_s2] sm:$0xff] %vm931_vm9, %v1483_v6 }
 0x4bd   : > { %2084 = shalt.err (!%p2081_p4)
}
 0x4be   : > { %s2085_s12 = scalar_lea.hbm %s2851_s19, 128  ;;  %s2089_s10 = scalar_lea.hbm %s2936_s7, 256 }
 0x4bf   : > { %p2086_p6 = scmp.ne.s32.totalorder %s2851_s19, %s2085_s12  ;;  %p2090_p2 = scmp.lt.s32.totalorder %s2851_s19, %s2936_s7 }
 0x4c0   : > { %p2091_p5 = scmp.lt.s32.totalorder %s2089_s10, %s2085_s12 }
 0x4c1   : > { %p2087_p7 = pnand %p2086_p6, %p2974_p10 }
 0x4c2   : > { %p2092_p12 = por %p2091_p5, %p2090_p2 }
 0x4c3   : > { %p2088_p8 = pneg %p2087_p7 }
 0x4c5   : > { %p2093_p0 = pnand %p2092_p12, %p2088_p8 }
 0x4c7   : > { %2096 = shalt.err (!%p2093_p0)
}
 0x4c8   : > { %1843 = dma.vmem_to_hbm [thread:$0]  (%p2974_p10), %s2853_s13, 128, %s2851_s19, %s1492_s21   ;;  %v1345_v5 = vadd.f32 %v1344_v13, %v2821_v23  ;;  %v1372_v50 = vrot.slane %v1371_v41, 1  ;;  %v1378_v16 = vadd.f32 %v1377_v42, %v1376_v3  ;;  %v1383_v30 = vadd.f32 %v1382_v12, %v1381_v38 }
 0x4c9   : > { %v1352_v18 = vadd.f32 %v1351_v49, %v1350_v63  ;;  %v1338_v1 = vadd.f32 %v1337_v43, %v1336_v46  ;;  %v1359_v32 = vadd.f32 %v1358_v2, %v1357_v60  ;;  %v1366_v44 = vadd.f32 %v1365_v31, %v1364_v39  ;;  %s367_s2 = scalar_lea.vmem [#allocation10], %s2418_s9  ;;  %s2891_s19 = scalar_lea.hbm %s2935_s6, %s1684_s22 }
 0x4ca   : > { %v1379_v24 = vrot.slane %v1378_v16, 1  ;;  %v1384_v28 = vrot.slane %v1383_v30, 2  ;;  %v1373_v34 = vadd.f32 %v1372_v50, %v1371_v41  ;;  %s1505_s13 = sshll.u32 %s367_s2, 4  ;;  %s1487_s21 = scalar_lea.sflag [#allocation4], %s2406_s26  ;;  %s1506_s13 = int_to_ptr.vmem [resolvable:$true] %s1505_s13 }
 0x4cb   : > { %v1396_v45 = vsel %vm916_vm2, %v1345_v5, %v1338_v1  ;;  %s2097_s9 = scalar_lea.vmem %s1506_s13, 128  ;;  %s2190_s16 = smov [#allocation10]  }
 0x4cc   : > { %v1385_v14 = vadd.f32 %v1384_v28, %v1383_v30  ;;  %v1397_v58 = vsel %vm918_vm3, %v1352_v18, %v1396_v45  ;;  %v1380_v25 = vadd.f32 %v1379_v24, %v1378_v16  ;;  %p2098_p3 = scmp.ne.s32.totalorder %s1506_s13, %s2097_s9  ;;  %s2101_s14 = sshll.u32 %s2190_s16, 4  ;;  %s2102_s14 = int_to_ptr.vmem [resolvable:$false] %s2101_s14 }
 0x4cd   : > { %v1398_v53 = vsel %vm920_vm4, %v1359_v32, %v1397_v58  ;;  %s2103_s15 = scalar_lea.vmem %s2102_s14, 256  ;;  %p2104_p13 = scmp.lt.s32.totalorder %s1506_s13, %s2102_s14 }
 0x4ce   : > { %v1386_v54 = vrot.slane %v1385_v14, 1  ;;  %v1399_v55 = vsel %vm922_vm5, %v1366_v44, %v1398_v53  ;;  %p2099_p11 = pnand %p2098_p3, %p2974_p10  ;;  %p2105_p1 = scmp.lt.s32.totalorder %s2103_s15, %s2097_s9 }
 0x4cf   : > { %v1400_v23 = vsel %vm924_vm6, %v1373_v34, %v1399_v55 }
 0x4d0   : > { %v1387_v10 = vadd.f32 %v1386_v54, %v1385_v14  ;;  %v1401_v26 = vsel %vm926_vm7, %v1380_v25, %v1400_v23  ;;  %p2100_p9 = pneg %p2099_p11  ;;  %p2106_p4 = por %p2105_p1, %p2104_p13 }
 0x4d2   : > { %v1402_v57 = vsel %vm928_vm8, %v1387_v10, %v1401_v26  ;;  %p2107_p6 = pnand %p2106_p4, %p2100_p9 }
 0x4d3   : > { %1404 = vst [vmem:[%s367_s2] sm:$0xff] %v1402_v57 }
 0x4d4   : > { %2110 = shalt.err (!%p2107_p6)
}
 0x4d5   : > { %s2111_s28 = scalar_lea.hbm %s2891_s19, 128  ;;  %s2115_s0 = scalar_lea.hbm %s2935_s6, 256 }
 0x4d6   : > { %p2112_p7 = scmp.ne.s32.totalorder %s2891_s19, %s2111_s28  ;;  %p2116_p5 = scmp.lt.s32.totalorder %s2891_s19, %s2935_s6 }
 0x4d7   : > { %p2117_p12 = scmp.lt.s32.totalorder %s2115_s0, %s2111_s28 }
 0x4d8   : > { %p2113_p8 = pnand %p2112_p7, %p2974_p10 }
 0x4d9   : > { %p2118_p0 = por %p2117_p12, %p2116_p5 }
 0x4da   : > { %p2114_p2 = pneg %p2113_p8 }
 0x4dc   : > { %p2119_p3 = pnand %p2118_p0, %p2114_p2 }
 0x4de   : > { %2122 = shalt.err (!%p2119_p3)
}
 0x4df   : > { %1842 = dma.vmem_to_hbm [thread:$0]  (%p2974_p10), %s1506_s13, 128, %s2891_s19, %s1487_s21  }
 0x4e0 PF: > { %s1530_s30 = sand.u32 1, %s2165_s24   ;;  %p2975_p11 = scmp.ne.s32.totalorder %s2952_s8, 0 }
 0x4e1   : > { %p2976_p9 = scmp.ge.s32.totalorder %s2177_s27, 2  ;;  %s1531_s10 = scalar_lea.sflag [#allocation4], %s1530_s30 }
 0x4e3   : > { %p1861_p13 = pnand %p2976_p9, %p2975_p11 }
 0x4e5   : > { %p1862_p1 = pneg %p1861_p13 }
 0x4e7   : > { %2156 = dma.done.wait (%p1862_p1), %s1531_s10, 128  }
 0x4e8   : > { %2158 = vsyncadd (%p1862_p1), %s1531_s10, 4294967168  ;;  %s1540_s17 = scalar_lea.sflag [#allocation12], %s1530_s30 }
 0x4e9   : > { %2160 = dma.done.wait (%p1862_p1), %s1540_s17, 128  }
 0x4ea   : > { %2162 = vsyncadd (%p1862_p1), %s1540_s17, 4294967168  ;;  %s2977_s11 = sld [smem:[#allocation19_spill]]  ;;  %p28_p10 = scmp.ge.s32.totalorder %s2309_s23, 4  }
 0x4eb   : > { %s2978_s26 = sld [smem:[#allocation20_spill]]  ;;  %s2979_s24 = smov %s2169_s25 }
 0x4ec   : > { %s2981_s27 = smov %s2309_s23  ;;  %30 = sbr.rel (!%p28_p10) target bundleno = 14 (0xe), region = 127 }
 0x4f0   : > { %s2980_s25 = smov %s2977_s11 }
 0x4f1   :  { %1545 = vsyncpa [#allocation3], 1 }
 0x4f2   :  { %1547 = vsyncpa [#allocation3 + $0x1], 1 }
 0x4f3   :  { %1548 = vsyncpa [#allocation6], 1 }
 0x4f4   :  { %1550 = vsyncpa [#allocation6 + $0x1], 1 }
 0x4f5   :  { %1551 = vsyncpa [#allocation9], 1 }
 0x4f6   :  { %1552 = vsyncpa [#allocation4], 1 }
 0x4f7   :  { %1554 = vsyncpa [#allocation4 + $0x1], 1 }
 0x4f8   :  { %1555 = vsyncpa [#allocation12], 1 }
 0x4f9   :  { %1557 = vsyncpa [#allocation12 + $0x1], 1 }

</bundles_post_ra>
